<compile_context>
chip_gen: v7x
topology: tpu7x:2x2x1
jax: 0.10.0
libtpu: 0.0.40
codegen_flags: <defaults>
</compile_context>

<pallas_src>
import functools
import math

import jax
import jax.numpy as jnp
from jax.experimental import pallas as pl
from jax.experimental.pallas import tpu as pltpu

SIZE = 16        # kernel side length (self.size); matches "spatial=16"
_MAX_TB = 512    # max thetas per grid step (512*256*4B = 512 KiB out block)


def _round_up(x: int, m: int) -> int:
    return ((x + m - 1) // m) * m


def _make_factor(size: int, offset=None) -> jnp.ndarray:
    """Replicates KernelGenerator.__init__ exactly.

    The PyTorch module uses np.meshgrid (default indexing='xy'), so
    factor[i, j] = -((j - off_x)^2 + (i - off_y)^2) / 2.
    """
    if offset is None:
        off_x = off_y = size // 2
    else:
        off_x, off_y = (offset, offset) if isinstance(offset, int) else offset
    xx, yy = jnp.meshgrid(jnp.arange(size, dtype=jnp.float32),
                          jnp.arange(size, dtype=jnp.float32))  # 'xy' indexing
    return (-((xx - off_x) ** 2 + (yy - off_y) ** 2) / 2.0).astype(jnp.float32)


def _choose_tiling(B: int):
    """Pick (TB, B_pad): TB a multiple of 8, >=2 grid steps when B allows (v7x)."""
    B8 = _round_up(max(B, 1), 8)
    if B8 <= 8:
        tb = B8
    elif B8 <= 2 * _MAX_TB:
        tb = _round_up(pl.cdiv(B8, 2), 8)   # 2 parallel steps for v7x megacore
    else:
        tb = _MAX_TB
    b_pad = _round_up(B8, tb)
    return tb, b_pad


def _kernelgen_kernel(theta_ref, sfactor_ref, out_ref, *, size):
    # theta_ref:   (TB, 1)     f32 VMEM -- this step's slice of thetas
    # sfactor_ref: (1, S*S)    f32 VMEM -- constant (factor - factor.max()) row,
    #                                       resident across the grid
    # out_ref:     (TB, S*S)   f32 VMEM -- lane-dense output block
    t = theta_ref[...]                            # (TB, 1)
    scaled = t * size                             # theta * self.size[0]
    inv_pow2 = 1.0 / (scaled * scaled)            # (TB, 1), exact (tiny column)
    # (1, lanes) * (TB, 1) broadcasts to (TB, lanes); exp runs on the EUP.
    out_ref[...] = jnp.exp(sfactor_ref[...] * inv_pow2)


def kernel_generator_forward(theta, size: int = SIZE, offset=None):
    """theta: (B,) batch of scalar thetas (each == one PyTorch forward call)."""
    theta = jnp.asarray(theta, jnp.float32).reshape(-1)
    B = int(theta.shape[0])
    lanes = size * size

    factor = _make_factor(size, offset)                      # (size, size)
    # kernel/kernel.max() == exp((factor - factor.max())/pow2) -- fold the
    # normalization into the constant table (exact, works for any offset).
    sfactor = (factor - jnp.max(factor)).reshape(1, lanes)   # (1, size*size)

    tb, b_pad = _choose_tiling(B)
    theta_col = jnp.pad(theta, (0, b_pad - B), constant_values=1.0).reshape(b_pad, 1)

    out_flat = pl.pallas_call(
        functools.partial(_kernelgen_kernel, size=float(size)),
        out_shape=jax.ShapeDtypeStruct((b_pad, lanes), jnp.float32),
        grid_spec=pltpu.PrefetchScalarGridSpec(
            num_scalar_prefetch=0,
            grid=(b_pad // tb,),
            in_specs=[
                # Per-step (TB, 1) column of thetas.
                pl.BlockSpec((tb, 1), lambda i: (i, 0)),
                # Constant shifted-factor row, same block every step (DMA'd once).
                pl.BlockSpec((1, lanes), lambda i: (0, 0)),
            ],
            out_specs=pl.BlockSpec((tb, lanes), lambda i: (i, 0)),
        ),
        compiler_params=pltpu.CompilerParams(
            dimension_semantics=("parallel",),   # independent batch tiles (2 TCs on v7x)
        ),
    )(theta_col, sfactor)

    # Free, contiguous reshape back to (B, size, size); drop padding rows.
    return out_flat[:B].reshape(B, size, size)


def _kernelgen_reference(theta, size: int = SIZE, offset=None):
    """Pure-JAX mirror of the PyTorch forward, vmapped over scalar thetas."""
    factor = _make_factor(size, offset)

    def one(t):
        pow2 = (t * size) ** 2
        k = 1.0 / (2.0 * math.pi * pow2) * jnp.exp(factor / pow2)
        return k / jnp.max(k)

    return jax.vmap(one)(jnp.asarray(theta, jnp.float32).reshape(-1))


if __name__ == "__main__":
    key = jax.random.PRNGKey(0)

    # Small batch of positive scalar thetas (one per PyTorch forward call).
    B = 2
    theta = 0.5 + jax.random.uniform(key, (B,), dtype=jnp.float32)
    out = jax.block_until_ready(kernel_generator_forward(theta, size=SIZE))
    ref = _kernelgen_reference(theta, size=SIZE)
    assert out.shape == (B, SIZE, SIZE)
    assert jnp.allclose(out, ref, atol=1e-5, rtol=1e-4), "mismatch vs reference (B=2)"

    # Larger batch: exercises padding + the 2-step "parallel" grid path.
    theta2 = 0.5 + jax.random.uniform(jax.random.PRNGKey(1), (20,), dtype=jnp.float32)
    out2 = jax.block_until_ready(kernel_generator_forward(theta2, size=SIZE))
    ref2 = _kernelgen_reference(theta2, size=SIZE)
    assert jnp.allclose(out2, ref2, atol=1e-5, rtol=1e-4), "mismatch vs reference (B=20)"

    # Non-default asymmetric offset: handled exactly by the shifted-factor form.
    theta3 = 0.75 + 0.5 * jax.random.uniform(jax.random.PRNGKey(2), (4,), dtype=jnp.float32)
    out3 = jax.block_until_ready(kernel_generator_forward(theta3, size=SIZE, offset=(3, 5)))
    ref3 = _kernelgen_reference(theta3, size=SIZE, offset=(3, 5))
    assert jnp.allclose(out3, ref3, atol=1e-5, rtol=1e-4), "mismatch vs reference (offset)"

    print("KERNEL_OK")
</pallas_src>

<mosaic_0001>
module attributes {stable_mosaic.version = 11 : i64} {
  func.func @_kernelgen_kernel(%arg0: i32, %arg1: memref<8x1xf32, #tpu.memory_space<vmem>>, %arg2: memref<1x256xf32, #tpu.memory_space<vmem>>, %arg3: memref<8x256xf32, #tpu.memory_space<vmem>>) attributes {dimension_semantics = [#tpu.dimension_semantics<parallel>], iteration_bounds = array<i64: 1>, scalar_prefetch = 0 : i64, scratch_operands = 0 : i64, tpu.core_type = #tpu.core_type<tc>, window_params = [{transform_indices = @transform_0, window_bounds = array<i64: 8, 1>}, {pipeline_mode = #tpu.pipeline_mode<synchronous>, transform_indices = @transform_1, window_bounds = array<i64: 1, 256>}, {transform_indices = @transform_2, window_bounds = array<i64: 8, 256>}]} {
    %c0 = arith.constant 0 : index
    %c0_0 = arith.constant 0 : index
    %0 = vector.load %arg1[%c0, %c0_0] : memref<8x1xf32, #tpu.memory_space<vmem>>, vector<8x1xf32>
    %cst = arith.constant 1.600000e+01 : f32
    %1 = vector.broadcast %cst : f32 to vector<8x1xf32>
    %2 = arith.mulf %0, %1 : vector<8x1xf32>
    %3 = arith.mulf %2, %2 : vector<8x1xf32>
    %cst_1 = arith.constant 1.000000e+00 : f32
    %4 = vector.broadcast %cst_1 : f32 to vector<8x1xf32>
    %5 = arith.divf %4, %3 : vector<8x1xf32>
    %c0_2 = arith.constant 0 : index
    %c0_3 = arith.constant 0 : index
    %6 = vector.load %arg2[%c0_2, %c0_3] : memref<1x256xf32, #tpu.memory_space<vmem>>, vector<1x256xf32>
    %7 = vector.broadcast %6 : vector<1x256xf32> to vector<8x256xf32>
    %8 = vector.broadcast %5 : vector<8x1xf32> to vector<8x256xf32>
    %9 = arith.mulf %7, %8 : vector<8x256xf32>
    %10 = math.exp %9 : vector<8x256xf32>
    %c0_4 = arith.constant 0 : index
    %c0_5 = arith.constant 0 : index
    %11 = vector.load %arg3[%c0_4, %c0_5] : memref<8x256xf32, #tpu.memory_space<vmem>>, vector<8x256xf32>
    tpu.vector_store %arg3[%c0_4, %c0_5], %10 {strides = array<i32>} : memref<8x256xf32, #tpu.memory_space<vmem>>, vector<8x256xf32>,
    return
  }
  func.func @transform_0(%arg0: i32) -> (i32, i32) {
    %c0_i32 = arith.constant 0 : i32
    %c0_i32_0 = arith.constant 0 : i32
    return %arg0, %c0_i32 : i32, i32
  }
  func.func @transform_1(%arg0: i32) -> (i32, i32) {
    %c0_i32 = arith.constant 0 : i32
    %c0_i32_0 = arith.constant 0 : i32
    %c0_i32_1 = arith.constant 0 : i32
    return %c0_i32, %c0_i32_0 : i32, i32
  }
  func.func @transform_2(%arg0: i32) -> (i32, i32) {
    %c0_i32 = arith.constant 0 : i32
    %c0_i32_0 = arith.constant 0 : i32
    return %arg0, %c0_i32 : i32, i32
  }
}

</mosaic_0001>

<bundles_post_ra>
// kernel: tpu_custom_call.1
= control target key start
LH: loop header
LB: loop body
LE: loop exit
PB: predicated region body
PF: predicated region fallthrough
CT: control target
= control target key end

     0   :  { %s124_s0 = inlined_call_operand.vmem [shape: f32[8,1], index: 0, kind: input, shape index: {}]   ;;  %s125_s1 = inlined_call_operand.vmem [shape: f32[1,256], index: 1, kind: input, shape index: {}]   ;;  %s126_s2 = inlined_call_operand.hbm [shape: f32[8,256], index: 2, kind: output, shape index: {}]  }
   0x1   :  { %v12_v0 = vld [vmem:[%s124_s0] sm:$0xff] }
   0x2   :  { %7 = vsyncpa [#allocation3], 0  ;;  %v89_v1 = vmov 0   ;;  %v13_v2 = vmul.f32 16.0, %v12_v0  ;;  %v19_v5 = vlaneseq  ;;  %v17_v9 = vld [vmem:[%s125_s1] sm:$0x3] }
   0x3   :  { %58 = vset.pattern.permute.xlu0 %v89_v1  ;;  %s90_s0 = smov [#allocation2]  }
   0x4   :  { %v14_v3 = vmul.f32 %v13_v2, %v13_v2  ;;  %v20_v6 = vshrl.u32 %v19_v5, 7  ;;  %s48_s13 = sshll.u32 %s90_s0, 4  ;;  %s49_s13 = int_to_ptr.vmem [resolvable:$true] %s48_s13 }
   0x5   :  { %s65_s14 = scalar_lea.vmem %s49_s13, 256  ;;  %p70_p1 = scmp.lt.s32.totalorder %s49_s13, %s49_s13 }
   0x6   :  { %59 = vrcp.f32 %v14_v3  ;;  %v21_v7 = vsub.s32 0, %v20_v6  ;;  %v25_v8 = vsub.s32 1, %v20_v6  ;;  %p66_p0 = scmp.ne.s32.totalorder %s49_s13, %s65_s14  ;;  %p71_p2 = scmp.lt.s32.totalorder %s65_s14, %s65_s14 }
   0x8   :  { %v22_v10 = vrot.slane %v17_v9, %v21_v7  ;;  %v26_v11 = vrot.slane %v17_v9, %v25_v8  ;;  %p72_p3 = por %p71_p2, %p70_p1 }
   0xa   :  { %p73_p4 = pnand %p72_p3, %p66_p0 }
  0x10   :  { %v60_v4 = vpop.eup %59 }
  0x11   :  { %31 = vperm.xlu0 %58, %v60_v4  }
  0x90   :  { %v32_v12 = vpop.permute.xlu0 %31 }
  0x91   :  { %v34_v13 = vmul.f32 %v32_v12, %v22_v10  ;;  %v35_v14 = vmul.f32 %v32_v12, %v26_v11 }
  0x93   :  { %v36_v15 = vmul.f32 1.442695, %v34_v13  ;;  %v38_v16 = vmul.f32 1.442695, %v35_v14 }
  0x95   :  { %61 = vpow2.f32 %v36_v15 }
  0x96   :  { %63 = vpow2.f32 %v38_v16 }
  0x9f   :  { %v62_v17 = vpop.eup %61 }
  0xa0   :  { %v64_v18 = vpop.eup %63  ;;  %40 = vst [vmem:[#allocation2] sm:$0xff] %v62_v17 }
  0xa1   :  { %41 = vst [vmem:[#allocation2 + $0x8] sm:$0xff] %v64_v18 }
  0xa2   :  { %76 = shalt.err (!%p73_p4)
}
  0xa3   :  { %s77_s16 = scalar_lea.hbm %s126_s2, 256 }
  0xa4   :  { %p78_p5 = scmp.ne.s32.totalorder %s126_s2, %s77_s16  ;;  %p81_p6 = scmp.lt.u32.totalorder %s77_s16, %s126_s2 }
  0xa6   :  { %p83_p7 = pnand %p81_p6, %p78_p5 }
  0xa8   :  { %86 = shalt.err (!%p83_p7)
}
  0xa9   :  { %51 = dma.vmem_to_hbm [thread:$0]  %s49_s13, 256, %s126_s2, [#allocation3]  }
  0xaa   :  { %87 = dma.done.wait [#allocation3], 256  }
  0xab   :  { %88 = vsyncadd [#allocation3], 4294967040 }
  0xac   :  { %55 = vsyncpa [#allocation3], 1 }

</bundles_post_ra>
